<compile_context>
chip_gen: v7x
topology: tpu7x:2x2x1
jax: 0.10.0
libtpu: 0.0.40
codegen_flags: <defaults>
</compile_context>

<pallas_src>
import functools

import numpy as np
import jax
import jax.numpy as jnp
from jax.experimental import pallas as pl
from jax.experimental.pallas import tpu as pltpu


def _bce_sum_kernel(pred_ref, targ_ref, acc_ref, *, s_total, tile_s, tiles_per_part):
    """One grid step = one S-tile of every (sample, class) row.

    pred_ref, targ_ref : (NC, tile_s) blocks (native dtype, cast to f32 here)
    acc_ref            : (1, NC, 1) f32 VMEM-resident accumulator for this
                         parallel chunk (same output block across the tile axis)
    """
    p = pl.program_id(0)          # parallel chunk
    t = pl.program_id(1)          # tile within chunk (reduction axis)

    @pl.when(t == 0)
    def _():
        acc_ref[...] = jnp.zeros_like(acc_ref)

    x = pred_ref[...].astype(jnp.float32)   # (NC, tile_s) logits
    z = targ_ref[...].astype(jnp.float32)   # (NC, tile_s) targets

    # Mask lanes beyond the true spatial size S (covers padded lanes, the
    # partial last tile, and fully-duplicated clamped tiles).
    base = (p * tiles_per_part + t) * tile_s
    lane = jax.lax.broadcasted_iota(jnp.int32, x.shape, 1)
    in_bounds = (base + lane) < s_total

    x = jnp.where(in_bounds, x, 0.0)
    z = jnp.where(in_bounds, z, 0.0)
    # BCEWithLogitsLoss(reduction='none'), numerically stable:
    #   max(x, 0) - x*z + log1p(exp(-|x|))
    bce = jnp.maximum(x, 0.0) - x * z + jnp.log1p(jnp.exp(-jnp.abs(x)))
    bce = jnp.where(in_bounds, bce, 0.0)

    # Per-(sample, class) partial sum for this tile; accumulate in VMEM.
    acc_ref[...] += jnp.sum(bce, axis=-1, keepdims=True)[None]


def celoss4mots(predict, target, *, num_classes=3, ignore_index=None,
                max_tile_lanes=65536):
    """predict/target: (N, C, D, H, W), any float (or int for target) dtype."""
    assert predict.shape == target.shape, 'predict & target shape do not match'
    N, C, D, H, W = predict.shape
    assert C == num_classes
    S = D * H * W
    NC = N * C

    # Free reshape (contiguous) — no transpose, no extra HBM read/write.
    p2 = predict.reshape(NC, S)
    t2 = target.reshape(NC, S)

    # Pad the lane axis to a multiple of 128 only when needed (rare for real
    # MOTS volumes); padded lanes are masked out in-kernel anyway.
    S_pad = ((S + 127) // 128) * 128
    if S_pad != S:
        p2 = jnp.pad(p2, ((0, 0), (0, S_pad - S)))
        t2 = jnp.pad(t2, ((0, 0), (0, S_pad - S)))

    # Tile budget: keep 2 inputs x 2 pipeline buffers within ~8 MiB so the
    # kernel fits every generation's scoped VMEM (incl. v7x's 64 MiB physical)
    # with plenty of headroom, while each tile still moves >= ~1 MiB of data.
    rows_pad = ((NC + 7) // 8) * 8
    itemsize = max(predict.dtype.itemsize, target.dtype.itemsize)
    vmem_budget = 8 * 1024 * 1024
    budget_tile = max(128, (vmem_budget // (rows_pad * itemsize * 2 * 2)) // 128 * 128)
    tile_s = int(min(budget_tile, max(128, (max_tile_lanes // 128) * 128), S_pad))
    num_blocks = -(-S_pad // tile_s)

    # Split the tile walk into P independent chunks (own accumulator each) so
    # the leading grid axis can be 'parallel' (sharded across v7x's two TCs).
    P = 2 if num_blocks >= 2 else 1
    T = -(-num_blocks // P)

    def in_map(p, t):
        # Clamp so the (rare) trailing duplicate program re-reads the last real
        # block; its contribution is fully masked out by the in-bounds check.
        return (0, jnp.minimum(p * T + t, num_blocks - 1))

    kernel = functools.partial(_bce_sum_kernel, s_total=S, tile_s=tile_s,
                               tiles_per_part=T)

    part_sums = pl.pallas_call(
        kernel,
        out_shape=jax.ShapeDtypeStruct((P, NC, 1), jnp.float32),
        grid_spec=pltpu.PrefetchScalarGridSpec(
            num_scalar_prefetch=0,
            grid=(P, T),
            in_specs=[
                pl.BlockSpec((NC, tile_s), in_map),
                pl.BlockSpec((NC, tile_s), in_map),
            ],
            out_specs=pl.BlockSpec((1, NC, 1), lambda p, t: (p, 0, 0)),
        ),
        compiler_params=pltpu.CompilerParams(
            dimension_semantics=("parallel", "arbitrary"),
            vmem_limit_bytes=32 * 1024 * 1024),
    )(p2, t2)

    # Finalisation: tiny O(N*C) work in plain JAX.
    bce_sum = jnp.sum(part_sums, axis=0).reshape(N, C)            # per (n, c) sum
    ce = bce_sum / jnp.float32(S)                                 # mean over D*H*W
    valid = (target[:, :, 0, 0, 0] != -1).astype(jnp.float32)     # (N, C)
    cls_sum = jnp.sum(ce * valid, axis=0)                         # (C,)
    cls_cnt = jnp.sum(valid, axis=0)                              # (C,)
    cls_loss = cls_sum / jnp.maximum(cls_cnt, 1.0)                # finite everywhere
    keep = cls_cnt > 0                                            # == "drop NaN classes"
    if ignore_index is not None:
        keep = keep & (jnp.arange(C) != ignore_index)
    keep_f = keep.astype(jnp.float32)
    return jnp.sum(cls_loss * keep_f) / jnp.sum(keep_f)


def _reference(predict, target, *, num_classes=3, ignore_index=None):
    """Pure NumPy reference mirroring the PyTorch forward."""
    losses = []
    with np.errstate(invalid='ignore', divide='ignore'):
        for i in range(num_classes):
            if i != ignore_index:
                x = predict[:, i].astype(np.float64)
                z = target[:, i].astype(np.float64)
                bce = np.maximum(x, 0.0) - x * z + np.log1p(np.exp(-np.abs(x)))
                ce = bce.mean(axis=(1, 2, 3))                       # (N,)
                valid = target[:, i, 0, 0, 0] != -1
                avg = ce[valid].sum() / valid.sum()                 # NaN if no valid sample
                losses.append(avg)
        losses = np.array(losses)
        losses = losses[losses == losses]                           # drop NaNs
        return (losses.sum() / losses.shape[0]).astype(np.float32)


def _run_case(key, shape, *, ignore_index, max_tile_lanes):
    N, C, D, H, W = shape
    kp, kt = jax.random.split(key)
    predict = jax.random.normal(kp, shape, dtype=jnp.float32)
    target = (jax.random.uniform(kt, shape) > 0.5).astype(jnp.float32)
    # Exercise validity / NaN-filter paths:
    #  - class 0 invalid for all samples -> per-class loss NaN -> filtered out
    #  - class 2, sample 1 invalid       -> only sample 0 averaged for class 2
    target = target.at[:, 0].set(-1.0)
    target = target.at[1, 2].set(-1.0)

    loss = celoss4mots(predict, target, num_classes=C, ignore_index=ignore_index,
                       max_tile_lanes=max_tile_lanes)
    loss = jax.block_until_ready(loss)
    ref = _reference(np.asarray(predict), np.asarray(target),
                     num_classes=C, ignore_index=ignore_index)
    assert np.allclose(np.asarray(loss), ref, rtol=1e-4, atol=1e-6), (loss, ref)


if __name__ == "__main__":
    key = jax.random.PRNGKey(0)
    k1, k2 = jax.random.split(key)

    # Case 1: single-tile path (S = 512, multiple of 128), no ignore_index.
    _run_case(k1, (2, 3, 4, 8, 16), ignore_index=None, max_tile_lanes=65536)

    # Case 2: multi-tile path with padding + clamped duplicate tile
    # (S = 544 -> padded to 640, tile 128, 5 blocks split 2-way) and ignore_index.
    _run_case(k2, (2, 3, 4, 8, 17), ignore_index=1, max_tile_lanes=128)

    print("KERNEL_OK")
</pallas_src>

<mosaic_0001>
module attributes {stable_mosaic.version = 11 : i64} {
  func.func @_bce_sum_kernel(%arg0: i32, %arg1: i32, %arg2: memref<6x512xf32, #tpu.memory_space<vmem>>, %arg3: memref<6x512xf32, #tpu.memory_space<vmem>>, %arg4: memref<1x6x1xf32, #tpu.memory_space<vmem>>) attributes {dimension_semantics = [#tpu.dimension_semantics<parallel>, #tpu.dimension_semantics<arbitrary>], iteration_bounds = array<i64: 1, 1>, scalar_prefetch = 0 : i64, scratch_operands = 0 : i64, tpu.core_type = #tpu.core_type<tc>, window_params = [{transform_indices = @transform_0, window_bounds = array<i64: 6, 512>}, {transform_indices = @transform_1, window_bounds = array<i64: 6, 512>}, {transform_indices = @transform_2, window_bounds = array<i64: 1, 6, 1>}]} {
    %c0_i32 = arith.constant 0 : i32
    %0 = arith.cmpi eq, %arg1, %c0_i32 : i32
    %1 = arith.extui %0 : i1 to i32
    %c0_i32_0 = arith.constant 0 : i32
    %2 = arith.cmpi ne, %1, %c0_i32_0 : i32
    scf.if %2 {
      %cst_16 = arith.constant 0.000000e+00 : f32
      %35 = vector.broadcast %cst_16 : f32 to vector<1x6x1xf32>
      %c0_17 = arith.constant 0 : index
      %c0_18 = arith.constant 0 : index
      %c0_19 = arith.constant 0 : index
      %36 = vector.load %arg4[%c0_17, %c0_18, %c0_19] : memref<1x6x1xf32, #tpu.memory_space<vmem>>, vector<1x6x1xf32>
      tpu.vector_store %arg4[%c0_17, %c0_18, %c0_19], %35 {strides = array<i32>} : memref<1x6x1xf32, #tpu.memory_space<vmem>>, vector<1x6x1xf32>,
    } else {
    }
    %c0 = arith.constant 0 : index
    %c0_1 = arith.constant 0 : index
    %3 = vector.load %arg2[%c0, %c0_1] : memref<6x512xf32, #tpu.memory_space<vmem>>, vector<6x512xf32>
    %c0_2 = arith.constant 0 : index
    %c0_3 = arith.constant 0 : index
    %4 = vector.load %arg3[%c0_2, %c0_3] : memref<6x512xf32, #tpu.memory_space<vmem>>, vector<6x512xf32>
    %c1_i32 = arith.constant 1 : i32
    %5 = arith.muli %arg0, %c1_i32 : i32
    %6 = arith.addi %5, %arg1 : i32
    %c512_i32 = arith.constant 512 : i32
    %7 = arith.muli %6, %c512_i32 : i32
    %8 = tpu.iota {dimensions = array<i32: 1>} : vector<6x512xi32>
    %9 = vector.broadcast %7 : i32 to vector<6x512xi32>
    %10 = arith.addi %9, %8 : vector<6x512xi32>
    %c512_i32_4 = arith.constant 512 : i32
    %11 = vector.broadcast %c512_i32_4 : i32 to vector<6x512xi32>
    %12 = arith.cmpi slt, %10, %11 : vector<6x512xi32>
    %cst = arith.constant 0.000000e+00 : f32
    %13 = vector.broadcast %cst : f32 to vector<6x512xf32>
    %14 = arith.select %12, %3, %13 : vector<6x512xi1>, vector<6x512xf32>
    %cst_5 = arith.constant 0.000000e+00 : f32
    %15 = vector.broadcast %cst_5 : f32 to vector<6x512xf32>
    %16 = arith.select %12, %4, %15 : vector<6x512xi1>, vector<6x512xf32>
    %cst_6 = arith.constant 0.000000e+00 : f32
    %17 = vector.broadcast %cst_6 : f32 to vector<6x512xf32>
    %18 = arith.maximumf %14, %17 : vector<6x512xf32>
    %19 = arith.mulf %14, %16 : vector<6x512xf32>
    %20 = arith.subf %18, %19 : vector<6x512xf32>
    %21 = math.absf %14 : vector<6x512xf32>
    %cst_7 = arith.constant 0.000000e+00 : f32
    %22 = vector.broadcast %cst_7 : f32 to vector<6x512xf32>
    %23 = arith.subf %22, %21 : vector<6x512xf32>
    %24 = math.exp %23 : vector<6x512xf32>
    %25 = math.log1p %24 : vector<6x512xf32>
    %26 = arith.addf %20, %25 : vector<6x512xf32>
    %cst_8 = arith.constant 0.000000e+00 : f32
    %27 = vector.broadcast %cst_8 : f32 to vector<6x512xf32>
    %28 = arith.select %12, %26, %27 : vector<6x512xi1>, vector<6x512xf32>
    %c0_9 = arith.constant 0 : index
    %c0_10 = arith.constant 0 : index
    %c0_11 = arith.constant 0 : index
    %29 = vector.load %arg4[%c0_9, %c0_10, %c0_11] : memref<1x6x1xf32, #tpu.memory_space<vmem>>, vector<1x6x1xf32>
    %cst_12 = arith.constant dense<0.000000e+00> : vector<6xf32>
    %30 = vector.multi_reduction <add>, %28, %cst_12 [1] : vector<6x512xf32> to vector<6xf32>
    %31 = vector.shape_cast %30 : vector<6xf32> to vector<6x1xf32>
    %32 = vector.shape_cast %31 : vector<6x1xf32> to vector<1x6x1xf32>
    %33 = arith.addf %29, %32 : vector<1x6x1xf32>
    %c0_13 = arith.constant 0 : index
    %c0_14 = arith.constant 0 : index
    %c0_15 = arith.constant 0 : index
    %34 = vector.load %arg4[%c0_13, %c0_14, %c0_15] : memref<1x6x1xf32, #tpu.memory_space<vmem>>, vector<1x6x1xf32>
    tpu.vector_store %arg4[%c0_13, %c0_14, %c0_15], %33 {strides = array<i32>} : memref<1x6x1xf32, #tpu.memory_space<vmem>>, vector<1x6x1xf32>,
    return
  }
  func.func @transform_0(%arg0: i32, %arg1: i32) -> (i32, i32) {
    %c1_i32 = arith.constant 1 : i32
    %0 = arith.muli %arg0, %c1_i32 : i32
    %1 = arith.addi %0, %arg1 : i32
    %c0_i32 = arith.constant 0 : i32
    %2 = arith.minsi %1, %c0_i32 : i32
    %c0_i32_0 = arith.constant 0 : i32
    %c0_i32_1 = arith.constant 0 : i32
    return %c0_i32_0, %2 : i32, i32
  }
  func.func @transform_1(%arg0: i32, %arg1: i32) -> (i32, i32) {
    %c1_i32 = arith.constant 1 : i32
    %0 = arith.muli %arg0, %c1_i32 : i32
    %1 = arith.addi %0, %arg1 : i32
    %c0_i32 = arith.constant 0 : i32
    %2 = arith.minsi %1, %c0_i32 : i32
    %c0_i32_0 = arith.constant 0 : i32
    %c0_i32_1 = arith.constant 0 : i32
    return %c0_i32_0, %2 : i32, i32
  }
  func.func @transform_2(%arg0: i32, %arg1: i32) -> (i32, i32, i32) {
    %c0_i32 = arith.constant 0 : i32
    %c0_i32_0 = arith.constant 0 : i32
    %c0_i32_1 = arith.constant 0 : i32
    return %arg0, %c0_i32, %c0_i32_0 : i32, i32, i32
  }
}

</mosaic_0001>

<bundles_post_ra>
// kernel: tpu_custom_call.1
= control target key start
LH: loop header
LB: loop body
LE: loop exit
PB: predicated region body
PF: predicated region fallthrough
CT: control target
= control target key end

     0   :  { %7 = vsyncpa [#allocation3], 0  ;;  %s335_s0 = inlined_call_operand.hbm [shape: f32[6,512], index: 0, kind: input, shape index: {}]   ;;  %s336_s1 = inlined_call_operand.hbm [shape: f32[6,512], index: 1, kind: input, shape index: {}]   ;;  %s337_s2 = inlined_call_operand.vmem [shape: f32[1,6,1], index: 2, kind: output, shape index: {}]  }
   0x1   :  { %8 = vsyncpa [#allocation5], 0  ;;  %s256_s9 = smov [#allocation2]   ;;  %s257_s11 = smov [#allocation4]  }
   0x2   :  { %s21_s10 = sshll.u32 %s256_s9, 4  ;;  %s37_s12 = sshll.u32 %s257_s11, 4  ;;  %s22_s10 = int_to_ptr.vmem [resolvable:$true] %s21_s10  ;;  %s38_s12 = int_to_ptr.vmem [resolvable:$true] %s37_s12 }
   0x3   :  { %s208_s15 = scalar_lea.hbm %s335_s0, 512 }
   0x4   :  { %p209_p0 = scmp.ne.s32.totalorder %s335_s0, %s208_s15  ;;  %p212_p1 = scmp.lt.u32.totalorder %s208_s15, %s335_s0 }
   0x6   :  { %p214_p2 = pnand %p212_p1, %p209_p0 }
   0x8   :  { %217 = shalt.err (!%p214_p2)
}
   0x9   :  { %s218_s20 = scalar_lea.vmem %s22_s10, 512  ;;  %p223_p4 = scmp.lt.s32.totalorder %s22_s10, %s22_s10 }
   0xa   :  { %p219_p3 = scmp.ne.s32.totalorder %s22_s10, %s218_s20  ;;  %p224_p5 = scmp.lt.s32.totalorder %s218_s20, %s218_s20 }
   0xc   :  { %p225_p6 = por %p224_p5, %p223_p4 }
   0xe   :  { %p226_p7 = pnand %p225_p6, %p219_p3 }
  0x10   :  { %229 = shalt.err (!%p226_p7)
}
  0x11   :  { %24 = dma.hbm_to_vmem [thread:$0]  %s335_s0, 512, %s22_s10, [#allocation3]  }
  0x12   :  { %s230_s25 = scalar_lea.hbm %s336_s1, 512 }
  0x13   :  { %p231_p8 = scmp.ne.s32.totalorder %s336_s1, %s230_s25  ;;  %p234_p9 = scmp.lt.u32.totalorder %s230_s25, %s336_s1 }
  0x15   :  { %p236_p10 = pnand %p234_p9, %p231_p8 }
  0x17   :  { %239 = shalt.err (!%p236_p10)
}
  0x18   :  { %s240_s30 = scalar_lea.vmem %s38_s12, 512  ;;  %p245_p12 = scmp.lt.s32.totalorder %s38_s12, %s38_s12 }
  0x19   :  { %p241_p11 = scmp.ne.s32.totalorder %s38_s12, %s240_s30  ;;  %p246_p13 = scmp.lt.s32.totalorder %s240_s30, %s240_s30 }
  0x1b   :  { %p247_p0 = por %p246_p13, %p245_p12 }
  0x1d   :  { %p248_p1 = pnand %p247_p0, %p241_p11 }
  0x1f   :  { %251 = shalt.err (!%p248_p1)
}
  0x20   :  { %40 = dma.hbm_to_vmem [thread:$0]  %s336_s1, 512, %s38_s12, [#allocation5]  }
  0x21   :  { %252 = dma.done.wait [#allocation3], 512  }
  0x22   :  { %253 = vsyncadd [#allocation3], 4294966784 }
  0x23   :  { %254 = dma.done.wait [#allocation5], 512  }
  0x24   :  { %255 = vsyncadd [#allocation5], 4294966784  ;;  %vm59_vm0 = vcmask 5120   ;;  %v258_v0 = vmov 0.0   ;;  %v61_v1 = vld [vmem:[#allocation2] sm:$0x3f] }
  0x25   :  { %60 = vst.msk [vmem:[%s337_s2] sm:$0x3f] %vm59_vm0, %v258_v0  ;;  %v62_v2 = vld [vmem:[#allocation2 + $0x8] sm:$0x3f]  ;;  %v302_v3 = vld [vmem:[#allocation2 + $0x10] sm:$0x3f] }
  0x26   :  { %v304_v4 = vld [vmem:[#allocation2 + $0x18] sm:$0x3f]  ;;  %v105_v5 = vand.u32 2147483647, %v61_v1  ;;  %v106_v6 = vand.u32 2147483647, %v62_v2 }
  0x27   :  { %v107_v7 = vand.u32 2147483647, %v302_v3  ;;  %v108_v8 = vand.u32 2147483647, %v304_v4  ;;  %v65_v27 = vld [vmem:[#allocation4] sm:$0x3f] }
  0x28   :  { %v109_v9 = vsub.f32 0.0, %v105_v5  ;;  %v110_v10 = vsub.f32 0.0, %v106_v6  ;;  %v66_v29 = vld [vmem:[#allocation4 + $0x8] sm:$0x3f]  ;;  %v67_v30 = vld [vmem:[#allocation4 + $0x10] sm:$0x3f]  ;;  %v97_v35 = vmul.f32 %v65_v27, %v61_v1 }
  0x29   :  { %v111_v11 = vsub.f32 0.0, %v107_v7  ;;  %v112_v12 = vsub.f32 0.0, %v108_v8  ;;  %v68_v33 = vld [vmem:[#allocation4 + $0x18] sm:$0x3f]  ;;  %v93_v34 = vmax.f32 %v61_v1, 0.0  ;;  %v94_v38 = vmax.f32 %v62_v2, 0.0 }
  0x2a   :  { %v113_v13 = vmul.f32 1.442695, %v109_v9  ;;  %v115_v14 = vmul.f32 1.442695, %v110_v10  ;;  %v98_v39 = vmul.f32 %v66_v29, %v62_v2  ;;  %v95_v42 = vmax.f32 %v302_v3, 0.0 }
  0x2b   :  { %v117_v15 = vmul.f32 1.442695, %v111_v11  ;;  %v119_v16 = vmul.f32 1.442695, %v112_v12  ;;  %v99_v43 = vmul.f32 %v67_v30, %v302_v3  ;;  %v96_v45 = vmax.f32 %v304_v4, 0.0 }
  0x2c   :  { %192 = vpow2.f32 %v113_v13  ;;  %v100_v46 = vmul.f32 %v68_v33, %v304_v4  ;;  %v101_v50 = vsub.f32 %v93_v34, %v97_v35  ;;  %v102_v55 = vsub.f32 %v94_v38, %v98_v39 }
  0x2d   :  { %194 = vpow2.f32 %v115_v14  ;;  %v103_v60 = vsub.f32 %v95_v42, %v99_v43  ;;  %vm166_vm4 = vcmask 1045504  }
  0x2e   :  { %196 = vpow2.f32 %v117_v15  ;;  %v104_v2 = vsub.f32 %v96_v45, %v100_v46 }
  0x2f   :  { %198 = vpow2.f32 %v119_v16 }
  0x36   :  { %v193_v17 = vpop.eup %192 }
  0x37   :  { %v195_v18 = vpop.eup %194  ;;  %v121_v19 = vadd.f32 1.0, %v193_v17  ;;  %v124_v24 = vmul.f32 -0.5, %v193_v17  ;;  %v127_v36 = vand.u32 2147483647, %v193_v17 }
  0x38   :  { %v197_v20 = vpop.eup %196  ;;  %v130_v21 = vadd.f32 1.0, %v195_v18  ;;  %v133_v25 = vmul.f32 -0.5, %v195_v18  ;;  %v136_v40 = vand.u32 2147483647, %v195_v18 }
  0x39   :  { %v199_v22 = vpop.eup %198  ;;  %200 = vlog2.f32 %v121_v19  ;;  %v139_v23 = vadd.f32 1.0, %v197_v20  ;;  %v142_v28 = vmul.f32 -0.5, %v197_v20  ;;  %v125_v31 = vadd.f32 1.0, %v124_v24 }
  0x3a   :  { %202 = vlog2.f32 %v130_v21  ;;  %v148_v26 = vadd.f32 1.0, %v199_v22  ;;  %v151_v32 = vmul.f32 -0.5, %v199_v22  ;;  %v134_v37 = vadd.f32 1.0, %v133_v25 }
  0x3b   :  { %204 = vlog2.f32 %v139_v23  ;;  %v143_v41 = vadd.f32 1.0, %v142_v28  ;;  %v145_v44 = vand.u32 2147483647, %v197_v20  ;;  %v126_v47 = vmul.f32 %v193_v17, %v125_v31 }
  0x3c   :  { %206 = vlog2.f32 %v148_v26  ;;  %v152_v48 = vadd.f32 1.0, %v151_v32  ;;  %vm312_vm1 = vcmp.lt.f32.partialorder %v127_v36, 0.0004427343  ;;  %v135_v52 = vmul.f32 %v195_v18, %v134_v37  ;;  %v165_v18 = vld [vmem:[%s337_s2] sm:$0x3f] }
  0x3d   :  { %v154_v53 = vand.u32 2147483647, %v199_v22  ;;  %vm316_vm2 = vcmp.lt.f32.partialorder %v136_v40, 0.0004427343  ;;  %v144_v58 = vmul.f32 %v197_v20, %v143_v41  ;;  %vm146_vm3 = vcmp.lt.f32.partialorder %v145_v44, 0.0004427343 }
  0x3e   :  { %v153_v0 = vmul.f32 %v199_v22, %v152_v48 }
  0x3f   :  { %vm155_vm5 = vcmp.lt.f32.partialorder %v154_v53, 0.0004427343 }
  0x43   :  { %v201_v49 = vpop.eup %200 }
  0x44   :  { %v203_v54 = vpop.eup %202  ;;  %v123_v56 = vmul.f32 0.6931472, %v201_v49 }
  0x45   :  { %v205_v59 = vpop.eup %204  ;;  %v132_v61 = vmul.f32 0.6931472, %v203_v54 }
  0x46   :  { %v129_v62 = vsel %vm312_vm1, %v126_v47, %v123_v56  ;;  %v141_v63 = vmul.f32 0.6931472, %v205_v59  ;;  %v207_v1 = vpop.eup %206 }
  0x47   :  { %v138_v3 = vsel %vm316_vm2, %v135_v52, %v132_v61  ;;  %v157_v4 = vadd.f32 %v129_v62, %v101_v50  ;;  %v150_v6 = vmul.f32 0.6931472, %v207_v1 }
  0x48   :  { %v147_v5 = vsel %vm146_vm3, %v144_v58, %v141_v63  ;;  %v158_v7 = vadd.f32 %v138_v3, %v102_v55 }
  0x49   :  { %v159_v8 = vadd.f32 %v147_v5, %v103_v60  ;;  %v167_v9 = vsel %vm166_vm4, %v157_v4, 0.0  ;;  %v156_v10 = vsel %vm155_vm5, %v153_v0, %v150_v6 }
  0x4a   :  { %v168_v11 = vsel %vm166_vm4, %v158_v7, 0.0  ;;  %v160_v12 = vadd.f32 %v156_v10, %v104_v2 }
  0x4b   :  { %v169_v13 = vadd.f32 %v168_v11, %v167_v9  ;;  %v170_v14 = vsel %vm166_vm4, %v159_v8, 0.0 }
  0x4c   :  { %v172_v16 = vsel %vm166_vm4, %v160_v12, 0.0 }
  0x4d   :  { %v171_v15 = vadd.f32 %v170_v14, %v169_v13 }
  0x4f   :  { %v173_v17 = vadd.f32 %v172_v16, %v171_v15 }
  0x51   :  { %174 = vadd.xlane.f32.xlu0 %v173_v17 }
  0xde   :  { %v175_v19 = vpop.xlane.xlu0 %174 }
  0xdf   :  { %v176_v20 = vadd.f32 %v175_v19, %v165_v18 }
  0xe1   :  { %178 = vst.msk [vmem:[%s337_s2] sm:$0x3f] %vm59_vm0, %v176_v20 }
  0xe2   :  { %183 = vsyncpa [#allocation3], 1 }
  0xe3   :  { %184 = vsyncpa [#allocation5], 1 }

</bundles_post_ra>
